<compile_context>
chip_gen: v6e
topology: v6e:2x2x1
jax: 0.10.0
libtpu: 0.0.40
codegen_flags: <defaults>
</compile_context>

<pallas_src>
import jax
import jax.numpy as jnp
from jax import lax
from jax.experimental import pallas as pl
from jax.experimental.pallas import tpu as pltpu


def _round_up(a: int, b: int) -> int:
    return -(-a // b) * b


def _patch_proj_kernel(x_ref, w_ref, b_ref, o_ref):
    # x_ref: (tm, Kp) patches tile
    # w_ref: (tn, Kp) weight tile, row-major [N, K] (contracted as trans_b)
    # b_ref: (1, tn)  f32 bias
    # o_ref: (tm, tn)
    acc = lax.dot_general(
        x_ref[...], w_ref[...],
        dimension_numbers=(((1,), (1,)), ((), ())),   # contract K with K
        preferred_element_type=jnp.float32)
    o_ref[...] = (acc + b_ref[...]).astype(o_ref.dtype)


def _select_tm(K_pad, tn, n_tiles, in_itemsize, out_itemsize,
               vmem_budget=40 * 1024 * 1024):
    # Per-step VMEM: patches (double-buffered) + weight (single/double) + bias + out.
    w_bufs = 1 if n_tiles == 1 else 2
    fixed = w_bufs * tn * K_pad * in_itemsize + 2 * tn * 4
    for cand in (1024, 512, 256, 128, 64, 32, 16, 8):
        per_step = 2 * cand * K_pad * in_itemsize + 2 * cand * tn * out_itemsize
        if fixed + per_step <= vmem_budget:
            return cand
    return 8


def img_linear_backbone(x, weight, bias, patch_size, *, compute_dtype=None):
    """x: [B, C, H, W] (NCHW); weight: [d_model, C, P, P]; bias: [d_model].
    Returns [B, (H//P)*(W//P), d_model]. compute_dtype=jnp.bfloat16 halves HBM
    traffic on v6e/v7x (accumulation stays f32)."""
    B, C, H, W = x.shape
    d_model = weight.shape[0]
    P = patch_size
    assert H % P == 0 and W % P == 0
    Hp, Wp = H // P, W // P
    Np = Hp * Wp
    K = C * P * P
    M = B * Np

    cdtype = compute_dtype if compute_dtype is not None else x.dtype

    # --- glue: extract non-overlapping patches (single XLA pass; fusable into DMA) ---
    patches = x.reshape(B, C, Hp, P, Wp, P)
    patches = patches.transpose(0, 2, 4, 1, 3, 5)          # [B, Hp, Wp, C, P, P]
    patches = patches.reshape(M, K).astype(cdtype)         # [M, K]

    # conv weight [d_model, C, P, P] -> [N, K]   (reshape only; no transpose)
    w2d = weight.reshape(d_model, K).astype(cdtype)
    b2d = bias.reshape(1, d_model).astype(jnp.float32)

    # --- hardware-friendly padded shapes ---
    LANE = 128
    K_pad = _round_up(K, LANE)
    N_pad = _round_up(d_model, LANE)
    if N_pad > 1024:                      # tile N only for very large d_model
        tn = 512
        N_pad = _round_up(N_pad, tn)
    else:
        tn = N_pad
    n_tiles = N_pad // tn

    in_itemsize = jnp.dtype(cdtype).itemsize
    out_itemsize = jnp.dtype(x.dtype).itemsize
    tm = _select_tm(K_pad, tn, n_tiles, in_itemsize, out_itemsize)
    tm = min(tm, _round_up(M, 8))         # don't over-tile tiny inputs
    M_pad = _round_up(M, tm)
    m_tiles = M_pad // tm

    if (M_pad, K_pad) != (M, K):
        patches = jnp.pad(patches, ((0, M_pad - M), (0, K_pad - K)))
    if (N_pad, K_pad) != (d_model, K):
        w2d = jnp.pad(w2d, ((0, N_pad - d_model), (0, K_pad - K)))
    if N_pad != d_model:
        b2d = jnp.pad(b2d, ((0, 0), (0, N_pad - d_model)))

    # Single-buffer the grid-invariant weight/bias when N is not tiled.
    inv_kwargs = {"pipeline_mode": pl.Buffered(1)} if n_tiles == 1 else {}

    out = pl.pallas_call(
        _patch_proj_kernel,
        out_shape=jax.ShapeDtypeStruct((M_pad, N_pad), x.dtype),
        grid_spec=pltpu.PrefetchScalarGridSpec(
            num_scalar_prefetch=0,
            grid=(m_tiles, n_tiles),
            in_specs=[
                pl.BlockSpec((tm, K_pad), lambda i, j: (i, 0)),
                pl.BlockSpec((tn, K_pad), lambda i, j: (j, 0), **inv_kwargs),
                pl.BlockSpec((1, tn), lambda i, j: (0, j), **inv_kwargs),
            ],
            out_specs=pl.BlockSpec((tm, tn), lambda i, j: (i, j)),
        ),
        compiler_params=pltpu.CompilerParams(
            dimension_semantics=("parallel", "parallel"),
            vmem_limit_bytes=48 * 1024 * 1024,
            allow_input_fusion=[True, False, False],
        ),
    )(patches, w2d, b2d)

    if (M_pad, N_pad) != (M, d_model):
        out = out[:M, :d_model]
    return out.reshape(B, Np, d_model)


if __name__ == "__main__":
    # Small shapes consistent with the module's forward (in_chan defaults to 3).
    B, C, H, W = 2, 3, 16, 16
    patch_size = 8
    d_model = 32

    key = jax.random.PRNGKey(0)
    kx, kw, kb = jax.random.split(key, 3)

    x = jax.random.normal(kx, (B, C, H, W), dtype=jnp.float32)
    # Shapes match nn.Conv2d(C, d_model, P, stride=P).
    weight = jax.random.normal(kw, (d_model, C, patch_size, patch_size),
                               dtype=jnp.float32) * 0.05
    bias = jax.random.normal(kb, (d_model,), dtype=jnp.float32) * 0.01

    # f32 here so the tight reference check holds; pass compute_dtype=jnp.bfloat16
    # for the fast path on v6e/v7x.
    fwd = jax.jit(lambda xx, ww, bb: img_linear_backbone(xx, ww, bb, patch_size))
    out = jax.block_until_ready(fwd(x, weight, bias))

    # Pure-JAX reference (strided conv as einsum over patches).
    Hp, Wp = H // patch_size, W // patch_size
    px = x.reshape(B, C, Hp, patch_size, Wp, patch_size).transpose(0, 2, 4, 1, 3, 5)
    ref = jnp.einsum("bhwcij,ocij->bhwo", px, weight) + bias
    ref = ref.reshape(B, Hp * Wp, d_model)

    assert out.shape == (B, Hp * Wp, d_model)
    assert jnp.allclose(out, ref, atol=1e-4, rtol=1e-4)

    print("KERNEL_OK")
</pallas_src>

<mosaic_0001>
module attributes {stable_mosaic.version = 11 : i64} {
  func.func @_patch_proj_kernel(%arg0: i32, %arg1: i32, %arg2: memref<8x256xf32, #tpu.memory_space<vmem>>, %arg3: memref<128x256xf32, #tpu.memory_space<vmem>>, %arg4: memref<1x128xf32, #tpu.memory_space<vmem>>, %arg5: memref<8x128xf32, #tpu.memory_space<vmem>>) attributes {dimension_semantics = [#tpu.dimension_semantics<parallel>, #tpu.dimension_semantics<parallel>], iteration_bounds = array<i64: 1, 1>, scalar_prefetch = 0 : i64, scratch_operands = 0 : i64, tpu.core_type = #tpu.core_type<tc>, window_params = [{transform_indices = @transform_0, window_bounds = array<i64: 8, 256>}, {pipeline_mode = #tpu.pipeline_mode<synchronous>, transform_indices = @transform_1, window_bounds = array<i64: 128, 256>}, {pipeline_mode = #tpu.pipeline_mode<synchronous>, transform_indices = @transform_2, window_bounds = array<i64: 1, 128>}, {transform_indices = @transform_3, window_bounds = array<i64: 8, 128>}]} {
    %c0 = arith.constant 0 : index
    %c0_0 = arith.constant 0 : index
    %0 = vector.load %arg2[%c0, %c0_0] : memref<8x256xf32, #tpu.memory_space<vmem>>, vector<8x256xf32>
    %c0_1 = arith.constant 0 : index
    %c0_2 = arith.constant 0 : index
    %1 = vector.load %arg3[%c0_1, %c0_2] : memref<128x256xf32, #tpu.memory_space<vmem>>, vector<128x256xf32>
    %cst = arith.constant dense<0.000000e+00> : vector<8x128xf32>
    %2 = tpu.matmul %0, %1, %cst {dimension_numbers = #tpu.dot_dimension_numbers<[1], [1], [0], [0], [0, 0, 1, 0], [], []>} : vector<8x256xf32>, vector<128x256xf32>, vector<8x128xf32> -> vector<8x128xf32>
    %c0_3 = arith.constant 0 : index
    %c0_4 = arith.constant 0 : index
    %3 = vector.load %arg4[%c0_3, %c0_4] : memref<1x128xf32, #tpu.memory_space<vmem>>, vector<1x128xf32>
    %4 = vector.broadcast %3 : vector<1x128xf32> to vector<8x128xf32>
    %5 = arith.addf %2, %4 : vector<8x128xf32>
    %c0_5 = arith.constant 0 : index
    %c0_6 = arith.constant 0 : index
    %6 = vector.load %arg5[%c0_5, %c0_6] : memref<8x128xf32, #tpu.memory_space<vmem>>, vector<8x128xf32>
    tpu.vector_store %arg5[%c0_5, %c0_6], %5 {strides = array<i32>} : memref<8x128xf32, #tpu.memory_space<vmem>>, vector<8x128xf32>,
    return
  }
  func.func @transform_0(%arg0: i32, %arg1: i32) -> (i32, i32) {
    %c0_i32 = arith.constant 0 : i32
    %c0_i32_0 = arith.constant 0 : i32
    return %arg0, %c0_i32 : i32, i32
  }
  func.func @transform_1(%arg0: i32, %arg1: i32) -> (i32, i32) {
    %c0_i32 = arith.constant 0 : i32
    %c0_i32_0 = arith.constant 0 : i32
    return %arg1, %c0_i32 : i32, i32
  }
  func.func @transform_2(%arg0: i32, %arg1: i32) -> (i32, i32) {
    %c0_i32 = arith.constant 0 : i32
    %c0_i32_0 = arith.constant 0 : i32
    return %c0_i32, %arg1 : i32, i32
  }
  func.func @transform_3(%arg0: i32, %arg1: i32) -> (i32, i32) {
    %c0_i32 = arith.constant 0 : i32
    return %arg0, %arg1 : i32, i32
  }
}

</mosaic_0001>

<bundles_post_ra>
// kernel: _lambda_.2
= control target key start
LH: loop header
LB: loop body
LE: loop exit
PB: predicated region body
PF: predicated region fallthrough
CT: control target
= control target key end

     0   :  { %s325_s0 = inlined_call_operand.vmem [shape: f32[128,256], index: 0, kind: input, shape index: {}]   ;;  %s326_s1 = inlined_call_operand.vmem [shape: f32[1,128], index: 1, kind: input, shape index: {}]   ;;  %s327_s2 = inlined_call_operand.vmem [shape: f32[8,192], index: 2, kind: input, shape index: {}]   ;;  %s328_s3 = inlined_call_operand.<no memory space> [shape: f32[], index: 3, kind: input, shape index: {}]   ;;  %s329_s4 = inlined_call_operand.hbm [shape: f32[8,128], index: 4, kind: output, shape index: {}]  }
   0x1   :  { %v9_v0 = vstv %s328_s3 }
   0x2   :  { %v70_v1 = vld [vmem:[%s325_s0 + $0xf8] sm:$0xff]  ;;  %v69_v2 = vld [vmem:[%s325_s0 + $0xf0] sm:$0xff]  ;;  %v68_v3 = vld [vmem:[%s325_s0 + $0xe8] sm:$0xff]  ;;  %v28_v4 = vlaneseq }
   0x3   :  { %78 = vmatprep.subr.mxu0 %v70_v1  ;;  %v67_v6 = vld [vmem:[%s325_s0 + $0xe0] sm:$0xff]  ;;  %v66_v7 = vld [vmem:[%s325_s0 + $0xd8] sm:$0xff]  ;;  %v65_v9 = vld [vmem:[%s325_s0 + $0xd0] sm:$0xff] }
   0x4   :  { %79 = vmatpush1.xpose.msra.mxu0 %v69_v2  ;;  %v29_v5 = vand.u32 127, %v28_v4  ;;  %v64_v10 = vld [vmem:[%s325_s0 + $0xc8] sm:$0xff]  ;;  %v63_v12 = vld [vmem:[%s325_s0 + $0xc0] sm:$0xff] }
   0x5   :  { %80 = vmatprep.subr.mxu0 %v68_v3  ;;  %v163_v11 = vld [vmem:[%s327_s2 + $0x8] sm:$0xff] }
   0x6   :  { %v30_v8 = vadd.s32 128, %v29_v5 }
   0x8   :  { %81 = vmatpush1.xpose.msra.mxu0 %v67_v6  ;;  %vm31_vm0 = vcmp.lt.s32.totalorder %v30_v8, 192 }
   0x9   :  { %82 = vmatprep.subr.mxu0 %v66_v7  ;;  %v32_v13 = vsel %vm31_vm0, %v163_v11, %v9_v0 }
   0xc   :  { %83 = vmatpush1.xpose.msra.mxu0 %v65_v9 }
   0xd   :  { %84 = vmatprep.subr.mxu0 %v64_v10 }
   0xe   :  { %10 = vsyncpa [#allocation8], 0  ;;  %v62_v14 = vld [vmem:[%s325_s0 + $0xb8] sm:$0xff]  ;;  %142 = vmatprep.mubr.f32.mxu0 %v32_v13  ;;  %v61_v15 = vld [vmem:[%s325_s0 + $0xb0] sm:$0xff]  ;;  %s188_s6 = smov [#allocation7]  }
   0xf   :  { %v60_v16 = vld [vmem:[%s325_s0 + $0xa8] sm:$0xff]  ;;  %v59_v17 = vld [vmem:[%s325_s0 + $0xa0] sm:$0xff]  ;;  %v58_v18 = vld [vmem:[%s325_s0 + $0x98] sm:$0xff]  ;;  %s155_s7 = sshll.u32 %s188_s6, 4  ;;  %s156_s7 = int_to_ptr.vmem [resolvable:$true] %s155_s7 }
  0x10   :  { %85 = vmatpush1.xpose.msra.mxu0 %v63_v12  ;;  %v57_v19 = vld [vmem:[%s325_s0 + $0x90] sm:$0xff]  ;;  %v56_v20 = vld [vmem:[%s325_s0 + $0x88] sm:$0xff]  ;;  %v55_v21 = vld [vmem:[%s325_s0 + $0x80] sm:$0xff]  ;;  %s166_s8 = scalar_lea.vmem %s156_s7, 128  ;;  %p171_p1 = scmp.lt.s32.totalorder %s156_s7, %s156_s7 }
  0x11   :  { %86 = vmatprep.subr.mxu0 %v62_v14  ;;  %v54_v22 = vld [vmem:[%s325_s0 + $0x78] sm:$0xff]  ;;  %v53_v23 = vld [vmem:[%s325_s0 + $0x70] sm:$0xff]  ;;  %v52_v24 = vld [vmem:[%s325_s0 + $0x68] sm:$0xff]  ;;  %p167_p0 = scmp.ne.s32.totalorder %s156_s7, %s166_s8  ;;  %p172_p2 = scmp.lt.s32.totalorder %s166_s8, %s166_s8 }
  0x12   :  { %v51_v25 = vld [vmem:[%s325_s0 + $0x60] sm:$0xff]  ;;  %v50_v26 = vld [vmem:[%s325_s0 + $0x58] sm:$0xff]  ;;  %v49_v27 = vld [vmem:[%s325_s0 + $0x50] sm:$0xff] }
  0x13   :  { %v48_v28 = vld [vmem:[%s325_s0 + $0x48] sm:$0xff]  ;;  %v47_v29 = vld [vmem:[%s325_s0 + $0x40] sm:$0xff]  ;;  %v46_v30 = vld [vmem:[%s325_s0 + $0x38] sm:$0xff]  ;;  %p173_p3 = por %p172_p2, %p171_p1 }
  0x14   :  { %87 = vmatpush1.xpose.msra.mxu0 %v61_v15  ;;  %v45_v31 = vld [vmem:[%s325_s0 + $0x30] sm:$0xff]  ;;  %v44_v32 = vld [vmem:[%s325_s0 + $0x28] sm:$0xff]  ;;  %v43_v33 = vld [vmem:[%s325_s0 + $0x20] sm:$0xff] }
  0x15   :  { %88 = vmatprep.subr.mxu0 %v60_v16  ;;  %v42_v34 = vld [vmem:[%s325_s0 + $0x18] sm:$0xff]  ;;  %v41_v35 = vld [vmem:[%s325_s0 + $0x10] sm:$0xff]  ;;  %v40_v36 = vld [vmem:[%s325_s0 + $0x8] sm:$0xff]  ;;  %p174_p4 = pnand %p173_p3, %p167_p0 }
  0x16   :  { %v39_v37 = vld [vmem:[%s325_s0] sm:$0xff] }
  0x17   :  { %v17_v38 = vld [vmem:[%s327_s2] sm:$0xff] }
  0x18   :  { %89 = vmatpush1.xpose.msra.mxu0 %v59_v17  ;;  %v164_v39 = vld [vmem:[%s326_s1] ss:$0 sm:$0xff] }
  0x19   :  { %90 = vmatprep.subr.mxu0 %v58_v18 }
  0x1c   :  { %91 = vmatpush1.xpose.msra.mxu0 %v57_v19 }
  0x1d   :  { %92 = vmatprep.subr.mxu0 %v56_v20 }
  0x20   :  { %93 = vmatpush1.xpose.msra.mxu0 %v55_v21 }
  0x21   :  { %94 = vmatprep.subr.mxu0 %v54_v22 }
  0x24   :  { %95 = vmatpush1.xpose.msra.mxu0 %v53_v23 }
  0x25   :  { %96 = vmatprep.subr.mxu0 %v52_v24 }
  0x28   :  { %97 = vmatpush1.xpose.msra.mxu0 %v51_v25 }
  0x29   :  { %98 = vmatprep.subr.mxu0 %v50_v26 }
  0x2c   :  { %99 = vmatpush1.xpose.msra.mxu0 %v49_v27 }
  0x2d   :  { %100 = vmatprep.subr.mxu0 %v48_v28 }
  0x30   :  { %101 = vmatpush1.xpose.msra.mxu0 %v47_v29 }
  0x31   :  { %102 = vmatprep.subr.mxu0 %v46_v30 }
  0x34   :  { %103 = vmatpush1.xpose.msra.mxu0 %v45_v31 }
  0x35   :  { %104 = vmatprep.subr.mxu0 %v44_v32 }
  0x38   :  { %105 = vmatpush1.xpose.msra.mxu0 %v43_v33 }
  0x39   :  { %106 = vmatprep.subr.mxu0 %v42_v34 }
  0x3c   :  { %107 = vmatpush1.xpose.msra.mxu0 %v41_v35 }
  0x3d   :  { %108 = vmatprep.subr.mxu0 %v40_v36 }
  0x40   :  { %109 = vmatpush1.xpose.msra.mxu0 %v39_v37 }
  0x43   :  { %143 = vmatmul.mubr.f32.vlgmr.msra.gmra.mxu0 %v17_v38 }
 0x103   :  { %v144_v40 = vpop.f32.mrf.mxu0 }
 0x104   :  { %v145_v41 = vadd.f32 %v164_v39, %v144_v40 }
 0x105   :  { %v146_v42 = vpop.f32.mrf.mxu0 }
 0x106   :  { %148 = vst [vmem:[#allocation7] sm:$0xff] %v145_v41 }
 0x107   :  { %177 = shalt.err (!%p174_p4)
}
 0x108   :  { %158 = dma.vmem_to_hbm [thread:$0]  %s156_s7, 128, %s329_s4, [#allocation8]  }
 0x109   :  { %186 = dma.done.wait [#allocation8], 128  }
 0x10a   :  { %187 = vsyncadd [#allocation8], 4294967168 }
 0x10b   :  { %162 = vsyncpa [#allocation8], 1 }

</bundles_post_ra>
